<compile_context>
chip_gen: v5e
topology: v5e:2x2
jax: 0.10.0
libtpu: 0.0.40
codegen_flags: <defaults>
</compile_context>

<pallas_src>
import functools

import jax
import jax.numpy as jnp
from jax import lax
from jax.experimental import pallas as pl
from jax.experimental.pallas import tpu as pltpu


def _dice_kernel(x_ref, lab_ref, inter_ref, psum_ref, *,
                 n_pixels: int, tile_r: int, needs_mask: bool):
    # x_ref:     (1, C, tile_r, 128) logits tile, native dtype (f32 or bf16)
    # lab_ref:   (1, 1, tile_r, 128) class labels, native int dtype (int8/int32)
    # inter_ref: (1, 1, 128) f32 per-batch lane-wise intersection partials (accumulator)
    # psum_ref:  (1, 1, 128) f32 per-batch lane-wise sum(preds) partials (accumulator)
    j = pl.program_id(1)

    @pl.when(j == 0)
    def _init():
        inter_ref[...] = jnp.zeros_like(inter_ref)
        psum_ref[...] = jnp.zeros_like(psum_ref)

    x = x_ref[0].astype(jnp.float32)          # (C, tile_r, 128) -- upcast in-kernel
    lab = lab_ref[0].astype(jnp.int32)        # (1, tile_r, 128)
    C = x.shape[0]

    # Softmax over the class axis (leading, non-tiled axis -> pure elementwise VALU).
    m = jnp.max(x, axis=0, keepdims=True)     # (1, tile_r, 128)
    e = jnp.exp(x - m)                        # (C, tile_r, 128)  -- only full-size EUP op
    s = jnp.sum(e, axis=0)                    # (tile_r, 128)
    # Exact reciprocal keeps us inside the 1e-5 tolerance; approx=True would route to the
    # EUP fast path if more slack is ever needed.
    inv = pl.reciprocal(s)                    # (tile_r, 128)

    # Pick e at the target class without materializing a one-hot tensor or the full softmax.
    cls = lax.broadcasted_iota(jnp.int32, x.shape, 0)          # (C, tile_r, 128)
    e_t = jnp.sum(jnp.where(cls == lab, e, 0.0), axis=0)       # (tile_r, 128)

    inter_v = e_t * inv                        # per-pixel p[target]
    psum_v = s * inv                           # per-pixel sum_c p_c (== 1 up to rounding)

    if needs_mask:
        # Only emitted when H*W is not a multiple of the tile footprint.
        row = lax.broadcasted_iota(jnp.int32, (tile_r, 128), 0)
        lane = lax.broadcasted_iota(jnp.int32, (tile_r, 128), 1)
        pix = (j * tile_r + row) * 128 + lane
        valid = pix < n_pixels
        inter_v = jnp.where(valid, inter_v, 0.0)
        psum_v = jnp.where(valid, psum_v, 0.0)

    # Lane-wise accumulation: only a sublane fold per step; the single cross-lane reduce
    # happens once, in the wrapper.
    inter_ref[0] += jnp.sum(inter_v, axis=0, keepdims=True)    # (1, 128)
    psum_ref[0] += jnp.sum(psum_v, axis=0, keepdims=True)      # (1, 128)


def dice_loss(logits: jax.Array, targets: jax.Array, epsilon: float = 1e-7) -> jax.Array:
    """logits: (B, C, H, W) float (f32/bf16); targets: (B, H, W) int class labels."""
    B, C, H, W = logits.shape
    N = H * W
    R = pl.cdiv(N, 128)          # pixel rows of 128 lanes
    pad = R * 128 - N

    # Free, contiguous reshapes; dtypes pass through untouched (bf16 logits / int8 labels
    # are read at their native width and widened inside the kernel).
    x = logits.reshape(B, C, N)
    lab = targets.reshape(B, 1, N)
    if lab.dtype.itemsize > 4:
        lab = lab.astype(jnp.int32)
    if pad:
        # TODO(synk): only hit when H*W % 128 != 0; costs one extra HBM copy of the inputs.
        x = jnp.pad(x, ((0, 0), (0, 0), (0, pad)))
        lab = jnp.pad(lab, ((0, 0), (0, 0), (0, pad)))
    x = x.reshape(B, C, R, 128)
    lab = lab.reshape(B, 1, R, 128)

    # Tile sizing from a VMEM byte budget.  Counted at f32 so the in-kernel f32
    # intermediates (e, selected e, iota, ...) stay comfortably inside the scoped VMEM
    # limit on every generation (v5e/v6e: 128 MiB physical, v7x: 64 MiB).
    block_budget = 2 * 1024 * 1024
    tile_r = max(8, (block_budget // (4 * C * 128)) // 8 * 8)
    if tile_r >= R:
        tile_r = R                      # single row-tile; equals full dim, always legal
    num_tiles = pl.cdiv(R, tile_r)
    needs_mask = (pad != 0) or (R % tile_r != 0)

    kernel = functools.partial(_dice_kernel, n_pixels=N, tile_r=tile_r,
                               needs_mask=needs_mask)

    inter, psum = pl.pallas_call(
        kernel,
        out_shape=(
            jax.ShapeDtypeStruct((B, 1, 128), jnp.float32),
            jax.ShapeDtypeStruct((B, 1, 128), jnp.float32),
        ),
        grid_spec=pltpu.PrefetchScalarGridSpec(
            num_scalar_prefetch=0,
            grid=(B, num_tiles),
            in_specs=[
                pl.BlockSpec((1, C, tile_r, 128), lambda b, j: (b, 0, j, 0)),
                pl.BlockSpec((1, 1, tile_r, 128), lambda b, j: (b, 0, j, 0)),
            ],
            out_specs=(
                pl.BlockSpec((1, 1, 128), lambda b, j: (b, 0, 0)),
                pl.BlockSpec((1, 1, 128), lambda b, j: (b, 0, 0)),
            ),
        ),
        compiler_params=pltpu.CompilerParams(
            # Per-batch partial outputs make the batch axis race-free across TensorCores
            # (v7x megacore); the row-tile reduction axis stays sequential.
            dimension_semantics=("parallel", "arbitrary"),
            vmem_limit_bytes=48 * 1024 * 1024,
        ),
    )(x, lab)
    # TODO(synk): when B == 1, additionally split the row axis 2-way so both v7x cores work.

    # Tiny finalize in plain XLA: one cross-lane reduce + the Dice formula.
    intersection = jnp.sum(inter)
    preds_sum = jnp.sum(psum)
    onehot_sum = jnp.float32(B * N)     # sum(one_hot) is exactly B*H*W
    union = preds_sum + onehot_sum
    iou = (2.0 * intersection + jnp.float32(epsilon)) / (union + jnp.float32(epsilon))
    return 1.0 - iou


def _reference_dice_loss(logits, targets, epsilon=1e-7):
    # Pure-JAX mirror of the PyTorch DiceLoss(IOULoss) module, for correctness checking.
    B, C, H, W = logits.shape
    log_p = jax.nn.log_softmax(logits.astype(jnp.float32), axis=1)
    preds = jnp.exp(log_p).reshape(B, C, -1)                               # (B, C, HW)
    onehot = jax.nn.one_hot(targets.reshape(B, -1), C, dtype=jnp.float32)  # (B, HW, C)
    known = jnp.transpose(onehot, (0, 2, 1))                               # (B, C, HW)
    intersection = jnp.sum(preds * known)
    union = jnp.sum(preds + known)
    iou = (2.0 * intersection + epsilon) / (union + epsilon)
    return 1.0 - iou


if __name__ == "__main__":
    B, C, H, W = 2, 4, 16, 16
    key = jax.random.PRNGKey(0)
    k1, k2 = jax.random.split(key)
    logits = jax.random.normal(k1, (B, C, H, W), dtype=jnp.float32)
    targets = jax.random.randint(k2, (B, H, W), 0, C, dtype=jnp.int32)

    out = dice_loss(logits, targets)
    out = jax.block_until_ready(out)

    ref = _reference_dice_loss(logits, targets)
    assert jnp.allclose(out, ref, rtol=1e-5, atol=1e-6), (out, ref)
    print("KERNEL_OK")
</pallas_src>

<mosaic_0001>
module attributes {stable_mosaic.version = 11 : i64} {
  func.func @_dice_kernel(%arg0: i32, %arg1: i32, %arg2: memref<1x4x2x128xf32, #tpu.memory_space<vmem>>, %arg3: memref<1x1x2x128xi32, #tpu.memory_space<vmem>>, %arg4: memref<1x1x128xf32, #tpu.memory_space<vmem>>, %arg5: memref<1x1x128xf32, #tpu.memory_space<vmem>>) attributes {dimension_semantics = [#tpu.dimension_semantics<parallel>, #tpu.dimension_semantics<arbitrary>], iteration_bounds = array<i64: 2, 1>, scalar_prefetch = 0 : i64, scratch_operands = 0 : i64, tpu.core_type = #tpu.core_type<tc>, window_params = [{transform_indices = @transform_0, window_bounds = array<i64: 1, 4, 2, 128>}, {transform_indices = @transform_1, window_bounds = array<i64: 1, 1, 2, 128>}, {transform_indices = @transform_2, window_bounds = array<i64: 1, 1, 128>}, {transform_indices = @transform_3, window_bounds = array<i64: 1, 1, 128>}]} {
    %c0_i32 = arith.constant 0 : i32
    %0 = arith.cmpi eq, %arg1, %c0_i32 : i32
    %1 = arith.extui %0 : i1 to i32
    %c0_i32_0 = arith.constant 0 : i32
    %2 = arith.cmpi ne, %1, %c0_i32_0 : i32
    scf.if %2 {
      %cst_25 = arith.constant 0.000000e+00 : f32
      %38 = vector.broadcast %cst_25 : f32 to vector<1x1x128xf32>
      %c0_26 = arith.constant 0 : index
      %c0_27 = arith.constant 0 : index
      %c0_28 = arith.constant 0 : index
      %39 = vector.load %arg4[%c0_26, %c0_27, %c0_28] : memref<1x1x128xf32, #tpu.memory_space<vmem>>, vector<1x1x128xf32>
      tpu.vector_store %arg4[%c0_26, %c0_27, %c0_28], %38 {strides = array<i32>} : memref<1x1x128xf32, #tpu.memory_space<vmem>>, vector<1x1x128xf32>,
      %cst_29 = arith.constant 0.000000e+00 : f32
      %40 = vector.broadcast %cst_29 : f32 to vector<1x1x128xf32>
      %c0_30 = arith.constant 0 : index
      %c0_31 = arith.constant 0 : index
      %c0_32 = arith.constant 0 : index
      %41 = vector.load %arg5[%c0_30, %c0_31, %c0_32] : memref<1x1x128xf32, #tpu.memory_space<vmem>>, vector<1x1x128xf32>
      tpu.vector_store %arg5[%c0_30, %c0_31, %c0_32], %40 {strides = array<i32>} : memref<1x1x128xf32, #tpu.memory_space<vmem>>, vector<1x1x128xf32>,
    } else {
    }
    %c0 = arith.constant 0 : index
    %c0_1 = arith.constant 0 : index
    %c0_2 = arith.constant 0 : index
    %c0_3 = arith.constant 0 : index
    %3 = vector.load %arg2[%c0, %c0_1, %c0_2, %c0_3] : memref<1x4x2x128xf32, #tpu.memory_space<vmem>>, vector<1x4x2x128xf32>
    %4 = vector.shape_cast %3 : vector<1x4x2x128xf32> to vector<4x2x128xf32>
    %c0_4 = arith.constant 0 : index
    %c0_5 = arith.constant 0 : index
    %c0_6 = arith.constant 0 : index
    %c0_7 = arith.constant 0 : index
    %5 = vector.load %arg3[%c0_4, %c0_5, %c0_6, %c0_7] : memref<1x1x2x128xi32, #tpu.memory_space<vmem>>, vector<1x1x2x128xi32>
    %6 = vector.shape_cast %5 : vector<1x1x2x128xi32> to vector<1x2x128xi32>
    %cst = arith.constant dense<0xFF800000> : vector<2x128xf32>
    %7 = vector.multi_reduction <maximumf>, %4, %cst [0] : vector<4x2x128xf32> to vector<2x128xf32>
    %8 = vector.shape_cast %7 : vector<2x128xf32> to vector<1x2x128xf32>
    %9 = vector.broadcast %8 : vector<1x2x128xf32> to vector<4x2x128xf32>
    %10 = arith.subf %4, %9 : vector<4x2x128xf32>
    %11 = math.exp %10 : vector<4x2x128xf32>
    %cst_8 = arith.constant dense<0.000000e+00> : vector<2x128xf32>
    %12 = vector.multi_reduction <add>, %11, %cst_8 [0] : vector<4x2x128xf32> to vector<2x128xf32>
    %13 = tpu.reciprocal %12 : vector<2x128xf32> -> vector<2x128xf32>
    %14 = tpu.iota {dimensions = array<i32: 0>} : vector<4x2x128xi32>
    %15 = vector.broadcast %6 : vector<1x2x128xi32> to vector<4x2x128xi32>
    %16 = arith.cmpi eq, %14, %15 : vector<4x2x128xi32>
    %cst_9 = arith.constant 0.000000e+00 : f32
    %17 = vector.broadcast %cst_9 : f32 to vector<4x2x128xf32>
    %18 = arith.select %16, %11, %17 : vector<4x2x128xi1>, vector<4x2x128xf32>
    %cst_10 = arith.constant dense<0.000000e+00> : vector<2x128xf32>
    %19 = vector.multi_reduction <add>, %18, %cst_10 [0] : vector<4x2x128xf32> to vector<2x128xf32>
    %20 = arith.mulf %19, %13 : vector<2x128xf32>
    %21 = arith.mulf %12, %13 : vector<2x128xf32>
    %c0_11 = arith.constant 0 : index
    %c0_12 = arith.constant 0 : index
    %c0_13 = arith.constant 0 : index
    %22 = vector.load %arg4[%c0_11, %c0_12, %c0_13] : memref<1x1x128xf32, #tpu.memory_space<vmem>>, vector<1x1x128xf32>
    %23 = vector.shape_cast %22 : vector<1x1x128xf32> to vector<1x128xf32>
    %cst_14 = arith.constant dense<0.000000e+00> : vector<128xf32>
    %24 = vector.multi_reduction <add>, %20, %cst_14 [0] : vector<2x128xf32> to vector<128xf32>
    %25 = vector.shape_cast %24 : vector<128xf32> to vector<1x128xf32>
    %26 = arith.addf %23, %25 : vector<1x128xf32>
    %c0_15 = arith.constant 0 : index
    %c0_16 = arith.constant 0 : index
    %c0_17 = arith.constant 0 : index
    %27 = vector.load %arg4[%c0_15, %c0_16, %c0_17] : memref<1x1x128xf32, #tpu.memory_space<vmem>>, vector<1x1x128xf32>
    %28 = vector.shape_cast %27 : vector<1x1x128xf32> to vector<1x128xf32>
    %29 = vector.shape_cast %26 : vector<1x128xf32> to vector<1x1x128xf32>
    tpu.vector_store %arg4[%c0_15, %c0_16, %c0_17], %29 {strides = array<i32>} : memref<1x1x128xf32, #tpu.memory_space<vmem>>, vector<1x1x128xf32>,
    %c0_18 = arith.constant 0 : index
    %c0_19 = arith.constant 0 : index
    %c0_20 = arith.constant 0 : index
    %30 = vector.load %arg5[%c0_18, %c0_19, %c0_20] : memref<1x1x128xf32, #tpu.memory_space<vmem>>, vector<1x1x128xf32>
    %31 = vector.shape_cast %30 : vector<1x1x128xf32> to vector<1x128xf32>
    %cst_21 = arith.constant dense<0.000000e+00> : vector<128xf32>
    %32 = vector.multi_reduction <add>, %21, %cst_21 [0] : vector<2x128xf32> to vector<128xf32>
    %33 = vector.shape_cast %32 : vector<128xf32> to vector<1x128xf32>
    %34 = arith.addf %31, %33 : vector<1x128xf32>
    %c0_22 = arith.constant 0 : index
    %c0_23 = arith.constant 0 : index
    %c0_24 = arith.constant 0 : index
    %35 = vector.load %arg5[%c0_22, %c0_23, %c0_24] : memref<1x1x128xf32, #tpu.memory_space<vmem>>, vector<1x1x128xf32>
    %36 = vector.shape_cast %35 : vector<1x1x128xf32> to vector<1x128xf32>
    %37 = vector.shape_cast %34 : vector<1x128xf32> to vector<1x1x128xf32>
    tpu.vector_store %arg5[%c0_22, %c0_23, %c0_24], %37 {strides = array<i32>} : memref<1x1x128xf32, #tpu.memory_space<vmem>>, vector<1x1x128xf32>,
    return
  }
  func.func @transform_0(%arg0: i32, %arg1: i32) -> (i32, i32, i32, i32) {
    %c0_i32 = arith.constant 0 : i32
    %c0_i32_0 = arith.constant 0 : i32
    %c0_i32_1 = arith.constant 0 : i32
    return %arg0, %c0_i32, %arg1, %c0_i32_0 : i32, i32, i32, i32
  }
  func.func @transform_1(%arg0: i32, %arg1: i32) -> (i32, i32, i32, i32) {
    %c0_i32 = arith.constant 0 : i32
    %c0_i32_0 = arith.constant 0 : i32
    %c0_i32_1 = arith.constant 0 : i32
    return %arg0, %c0_i32, %arg1, %c0_i32_0 : i32, i32, i32, i32
  }
  func.func @transform_2(%arg0: i32, %arg1: i32) -> (i32, i32, i32) {
    %c0_i32 = arith.constant 0 : i32
    %c0_i32_0 = arith.constant 0 : i32
    %c0_i32_1 = arith.constant 0 : i32
    return %arg0, %c0_i32, %c0_i32_0 : i32, i32, i32
  }
  func.func @transform_3(%arg0: i32, %arg1: i32) -> (i32, i32, i32) {
    %c0_i32 = arith.constant 0 : i32
    %c0_i32_0 = arith.constant 0 : i32
    %c0_i32_1 = arith.constant 0 : i32
    return %arg0, %c0_i32, %c0_i32_0 : i32, i32, i32
  }
}

</mosaic_0001>

<bundles_post_ra>
// kernel: tpu_custom_call.1
= control target key start
LH: loop header
LB: loop body
LE: loop exit
PB: predicated region body
PF: predicated region fallthrough
CT: control target
= control target key end

     0   :  { %9 = vsyncpa [#allocation3], 0  ;;  %s1001_s0 = inlined_call_operand.hbm [shape: f32[2,4,2,128], index: 0, kind: input, shape index: {}]   ;;  %s1002_s1 = inlined_call_operand.hbm [shape: s32[2,1,2,128], index: 1, kind: input, shape index: {}]   ;;  %s1003_s2 = inlined_call_operand.hbm [shape: f32[2,1,128], index: 2, kind: output, shape index: {0}]   ;;  %s1004_s3 = inlined_call_operand.hbm [shape: f32[2,1,128], index: 3, kind: output, shape index: {1}]  }
   0x1   :  { %11 = vsyncpa [#allocation3 + $0x1], 0 }
   0x2   :  { %12 = vsyncpa [#allocation6], 0 }
   0x3   :  { %14 = vsyncpa [#allocation6 + $0x1], 0 }
   0x4   :  { %15 = vsyncpa [#allocation4], 0 }
   0x5   :  { %17 = vsyncpa [#allocation4 + $0x1], 0 }
   0x6   :  { %18 = vsyncpa [#allocation9], 0 }
   0x7   :  { %20 = vsyncpa [#allocation9 + $0x1], 0  ;;  %s807_s12 = smov 0   ;;  %s809_s13 = smov 0  }
   0x8   :  { %s811_s14 = smov 0   ;;  %s813_s15 = smov 0  }
   0x9   :  { %s815_s16 = smov 0   ;;  %s817_s17 = smov 0  }
   0xa LB: > { %s504_s18 = sadd.s32 4294967295, %s782_s17   ;;  %s505_s19 = sadd.s32 4294967294, %s782_s17   ;;  %s782_s17 = sphi %s817_s17, %s26_s17   ;;  %s778_s16 = sphi %s815_s16, %s1014_s16   ;;  %s774_s15 = sphi %s813_s15, %s1013_s15   ;;  %s770_s14 = sphi %s811_s14, %s1012_s14   ;;  %s766_s13 = sphi %s809_s13, %s1011_s13   ;;  %s762_s12 = sphi %s807_s12, %s1010_s12  }
   0xb   : > { %s38_s20 = sadd.s32 1, %s778_s16  ;;  %s47_s21 = sadd.s32 1, %s770_s14 }
   0xc   : > { %p40_p0 = scmp.ge.s32.totalorder %s38_s20, 2  ;;  %p54_p1 = scmp.ne.s32.totalorder %s770_s14, %s766_s13 }
   0xd   : > { %p55_p2 = scmp.eq.s32.totalorder %s782_s17, 0  ;;  %p60_p3 = scmp.ne.s32.totalorder %s766_s13, %s762_s12 }
   0xe   : > { %s1016_s20 = smov (%p40_p0, %s38_s20), 0  ;;  %p61_p5 = scmp.eq.s32.totalorder %s504_s18, 0 }
   0xf   : > { %p848_p4 = por %p55_p2, %p54_p1  ;;  %s42_s23 = ssub.s32 %s778_s16, %s1016_s20 }
  0x10   : > { %p112_p6 = scmp.eq.s32.totalorder %s504_s18, 1  ;;  %p45_p7 = scmp.eq.s32.totalorder %s42_s23, 0 }
  0x11   : > { %p854_p8 = por %p61_p5, %p60_p3  ;;  %p118_p10 = scmp.eq.s32.totalorder %s505_s19, 1 }
  0x12   : > { %p858_p9 = por %p112_p6, %p54_p1  ;;  %p507_p12 = scmp.ge.s32.totalorder %s782_s17, 2 }
  0x13   : > { %s863_s26 = scalar_select %p45_p7, %s770_s14, %s47_s21  }
  0x14   : > { %p865_p11 = por %p118_p10, %p60_p3  ;;  %p541_p13 = scmp.lt.s32.totalorder %s782_s17, 2 }
  0x15   : > { %s164_s28 = sand.u32 1, %s770_s14   ;;  %s518_s30 = sshll.u32 %s778_s16, 3 }
  0x16   : > { %s508_s29 = sshll.u32 %s164_s28, 3  ;;  %s174_s6 = scalar_lea.hbm %s1001_s0, %s518_s30 }
  0x17   : > { %s168_s7 = scalar_lea.vmem [#allocation2], %s508_s29  ;;  %s175_s9 = sshll.u32 %s174_s6, 4  ;;  %s176_s9 = int_to_ptr.hbm [resolvable:$true] %s175_s9 }
  0x18   : > { %s177_s8 = sshll.u32 %s168_s7, 4  ;;  %p878_p0 = pnand %p541_p13, %p848_p4  ;;  %s178_s8 = int_to_ptr.vmem [resolvable:$true] %s177_s8 }
  0x19   : > { %p513_p1 = scmp.ge.s32.totalorder %s782_s17, 1  ;;  %s165_s11 = scalar_lea.sflag [#allocation3], %s164_s28 }
  0x1a   : > { %s784_s18 = smov 32   ;;  %s785_s19 = smov 2  }
  0x1b   : > { %530 = dma.hbm_to_vmem [thread:$0]  (!%p878_p0), %s176_s9, 128, %s178_s8, %s165_s11, %s784_s18, %s784_s18, %s785_s19  }
  0x1c   : > { %p205_p2 = scmp.lt.s32.totalorder %s782_s17, 3  ;;  %s511_s21 = sshll.u32 %s164_s28, 1 }
  0x1d   : > { %s512_s23 = sshll.u32 %s778_s16, 1  ;;  %s191_s4 = scalar_lea.vmem [#allocation5], %s511_s21 }
  0x1e   : > { %p206_p3 = pnand %p513_p1, %p205_p2  ;;  %s196_s22 = scalar_lea.hbm %s1002_s1, %s512_s23 }
  0x1f   : > { %s200_s5 = sshll.u32 %s191_s4, 4  ;;  %s198_s6 = sshll.u32 %s196_s22, 4  ;;  %s201_s5 = int_to_ptr.vmem [resolvable:$true] %s200_s5  ;;  %s199_s6 = int_to_ptr.hbm [resolvable:$true] %s198_s6 }
  0x20   : > { %s188_s7 = scalar_lea.sflag [#allocation6], %s164_s28  ;;  %209 = sbr.rel (%p206_p3) target bundleno = 118 (0x76), region = 28 }
  0x21   : > { %533 = dma.hbm_to_vmem [thread:$0]  (!%p878_p0), %s199_s6, 32, %s201_s5, %s188_s7  }
  0x22   : > { %s893_s8 = sand.u32 (!%p206_p3), 1, %s766_s13  }
  0x23   : > { %s514_s9 = sshll.u32 (!%p206_p3), %s893_s8, 3  ;;  %s212_s11 = scalar_lea.sflag (!%p206_p3), [#allocation3], %s893_s8 }
  0x24   : > { %s215_s18 = scalar_lea.vmem (!%p206_p3), [#allocation2], %s514_s9 }
  0x25   : > { %745 = dma.done.wait (%p854_p8), %s212_s11, 128  }
  0x26   : > { %747 = vsyncadd (%p854_p8), %s212_s11, 4294967168  ;;  %s515_s28 = sshll.u32 %s893_s8, 1  ;;  %s222_s10 = scalar_lea.sflag [#allocation6], %s893_s8 }
  0x27   : > { %s903_s19 = scalar_lea.vmem [#allocation5], %s515_s28 }
  0x28   : > { %749 = dma.done.wait (%p854_p8), %s222_s10, 32  }
  0x29   : > { %751 = vsyncadd (%p854_p8), %s222_s10, 4294967264  ;;  %s910_s21 = scalar_lea.vmem [#allocation7], %s893_s8  ;;  %v786_v0 = vmov 0.0   ;;  %s914_s23 = scalar_lea.vmem [#allocation8], %s893_s8  ;;  %vm268_vm0 = vcmask 1041408  }
  0x2a   : > { %261 = vst [vmem:[%s910_s21] sm:$0x1] %v786_v0  ;;  %v263_v1 = vld [vmem:[%s215_s18] sm:$0x3]  ;;  %v264_v2 = vld [vmem:[%s215_s18 + $0x2] sm:$0x3]  ;;  %s359_s30 = scalar_lea.hbm %s1003_s2, %s774_s15  ;;  %s372_s5 = scalar_lea.hbm %s1004_s3, %s774_s15 }
  0x2b   : > { %262 = vst [vmem:[%s914_s23] sm:$0x1] %v786_v0  ;;  %v265_v3 = vld [vmem:[%s215_s18 + $0x4] sm:$0x3]  ;;  %v266_v4 = vld [vmem:[%s215_s18 + $0x6] sm:$0x3]  ;;  %v269_v5 = vsel %vm268_vm0, %v263_v1, -inf }
  0x2c   : > { %v270_v6 = vsel %vm268_vm0, %v264_v2, -inf  ;;  %v271_v7 = vsel %vm268_vm0, %v265_v3, -inf  ;;  %v272_v8 = vsel %vm268_vm0, %v266_v4, -inf  ;;  %v267_v22 = vld [vmem:[%s903_s19] sm:$0x3]  ;;  %s361_s6 = sshll.u32 %s910_s21, 4  ;;  %s362_s6 = int_to_ptr.vmem [resolvable:$true] %s361_s6 }
  0x2d   : > { %v273_v9 = vmax.f32 %v269_v5, %v270_v6  ;;  %v274_v10 = vmax.f32 %v271_v7, %v272_v8  ;;  %vm309_vm1 = vcmp.eq.s32.totalorder %v267_v22, 0  ;;  %vm310_vm2 = vcmp.eq.s32.totalorder %v267_v22, 1  ;;  %s363_s7 = sshll.u32 %s359_s30, 4  ;;  %s374_s9 = sshll.u32 %s914_s23, 4  ;;  %s364_s7 = int_to_ptr.hbm [resolvable:$true] %s363_s7  ;;  %s946_s9 = int_to_ptr.vmem [resolvable:$true] %s374_s9 }
  0x2e   : > { %vm311_vm3 = vcmp.eq.s32.totalorder %v267_v22, 2  ;;  %vm312_vm4 = vcmp.eq.s32.totalorder %v267_v22, 3  ;;  %s944_s11 = sshll.u32 %s372_s5, 4  ;;  %s347_s15 = scalar_lea.sflag [#allocation4], %s893_s8  ;;  %s377_s11 = int_to_ptr.hbm [resolvable:$true] %s944_s11 }
  0x2f   : > { %v275_v11 = vmax.f32 %v273_v9, %v274_v10  ;;  %s678_s18 = sshra.s32 %s364_s7, 4  ;;  %s684_s24 = scalar_lea.hbm %s1003_s2, 2  ;;  %s679_s18 = int_to_ptr.hbm [resolvable:$true] %s678_s18 }
  0x30   : > { %s680_s28 = scalar_lea.hbm %s679_s18, 1  ;;  %p685_p7 = scmp.lt.s32.totalorder %s679_s18, %s1003_s2 }
  0x31   : > { %v276_v12 = vsub.f32 %v263_v1, %v275_v11  ;;  %v277_v13 = vsub.f32 %v264_v2, %v275_v11  ;;  %v278_v14 = vsub.f32 %v265_v3, %v275_v11  ;;  %v279_v15 = vsub.f32 %v266_v4, %v275_v11  ;;  %v326_v3 = vld [vmem:[%s910_s21] sm:$0x1]  ;;  %p681_p4 = scmp.ne.s32.totalorder %s679_s18, %s680_s28  ;;  %p686_p8 = scmp.lt.s32.totalorder %s684_s24, %s680_s28 }
  0x32   : > { %v336_v4 = vld [vmem:[%s914_s23] sm:$0x1] }
  0x33   : > { %v280_v16 = vmul.f32 1.442695, %v276_v12  ;;  %v282_v17 = vmul.f32 1.442695, %v277_v13  ;;  %v284_v18 = vmul.f32 1.442695, %v278_v14  ;;  %p682_p5 = pnand %p681_p4, %p858_p9  ;;  %p687_p10 = por %p686_p8, %p685_p7 }
  0x34   : > { %v286_v19 = vmul.f32 1.442695, %v279_v15 }
  0x35   : > { %594 = vpow2.f32 %v280_v16  ;;  %p683_p6 = pneg %p682_p5 }
  0x36   : > { %596 = vpow2.f32 %v282_v17 }
  0x37   : > { %598 = vpow2.f32 %v284_v18  ;;  %p688_p13 = pnand %p687_p10, %p683_p6 }
  0x38   : > { %600 = vpow2.f32 %v286_v19 }
  0x3b   : > { %v595_v20 = vpop.eup %594 }
  0x3c   : > { %v597_v21 = vpop.eup %596  ;;  %v288_v23 = vsel %vm268_vm0, %v595_v20, 0.0  ;;  %v313_v32 = vsel %vm309_vm1, %v595_v20, 0.0 }
  0x3d   : > { %v599_v24 = vpop.eup %598  ;;  %v289_v25 = vsel %vm268_vm0, %v597_v21, 0.0  ;;  %v314_v33 = vsel %vm310_vm2, %v597_v21, 0.0  ;;  %v317_v34 = vsel %vm268_vm0, %v313_v32, 0.0 }
  0x3e   : > { %v601_v26 = vpop.eup %600  ;;  %v290_v27 = vadd.f32 %v289_v25, %v288_v23  ;;  %v291_v28 = vsel %vm268_vm0, %v599_v24, 0.0  ;;  %v318_v35 = vsel %vm268_vm0, %v314_v33, 0.0  ;;  %v315_v36 = vsel %vm311_vm3, %v599_v24, 0.0 }
  0x3f   : > { %v293_v29 = vsel %vm268_vm0, %v601_v26, 0.0  ;;  %v319_v37 = vadd.f32 %v318_v35, %v317_v34  ;;  %v320_v38 = vsel %vm268_vm0, %v315_v36, 0.0  ;;  %v316_v41 = vsel %vm312_vm4, %v601_v26, 0.0 }
  0x40   : > { %v292_v30 = vadd.f32 %v291_v28, %v290_v27  ;;  %v322_v46 = vsel %vm268_vm0, %v316_v41, 0.0 }
  0x41   : > { %v321_v43 = vadd.f32 %v320_v38, %v319_v37 }
  0x42   : > { %v294_v31 = vadd.f32 %v293_v29, %v292_v30 }
  0x43   : > { %v323_v50 = vadd.f32 %v322_v46, %v321_v43 }
  0x44   : > { %602 = vrcp.f32 %v294_v31  ;;  %v306_v42 = vand.u32 2147483648, %v294_v31  ;;  %vm300_vm5 = vweird.f32 %v294_v31  ;;  %v304_v45 = vand.u32 2147483647, %v294_v31 }
  0x46   : > { %v307_v48 = vor.u32 1.1754944e-38, %v306_v42  ;;  %vm305_vm8 = vcmp.eq.f32.partialorder %v304_v45, 8.507059e+37 }
  0x4a   : > { %v603_v39 = vpop.eup %602 }
  0x4b   : > { %v296_v40 = vmul.f32 %v603_v39, %v294_v31  ;;  %vm301_vm6 = vweird.f32 %v603_v39 }
  0x4c   : > { %vm302_vm7 = vmor %vm300_vm5, %vm301_vm6 }
  0x4d   : > { %v297_v44 = vsub.f32 1.0, %v296_v40 }
  0x4f   : > { %v298_v47 = vmul.f32 %v603_v39, %v297_v44 }
  0x51   : > { %v299_v49 = vadd.f32 %v603_v39, %v298_v47 }
  0x53   : > { %v303_v51 = vsel %vm302_vm7, %v603_v39, %v299_v49 }
  0x54   : > { %v308_v52 = vsel %vm305_vm8, %v307_v48, %v303_v51 }
  0x55   : > { %v324_v53 = vmul.f32 %v323_v50, %v308_v52  ;;  %v325_v54 = vmul.f32 %v308_v52, %v294_v31 }
  0x57   : > { %v327_v55 = vsel %vm268_vm0, %v324_v53, 0.0  ;;  %v337_v56 = vsel %vm268_vm0, %v325_v54, 0.0 }
  0x58   : > { %v328_v57 = vrot.slane %v327_v55, 4  ;;  %v338_v58 = vrot.slane %v337_v56, 4 }
  0x5a   : > { %v329_v59 = vadd.f32 %v328_v57, %v327_v55  ;;  %v339_v60 = vadd.f32 %v338_v58, %v337_v56 }
  0x5c   : > { %v330_v61 = vrot.slane %v329_v59, 2  ;;  %v340_v62 = vrot.slane %v339_v60, 2 }
  0x5e   : > { %v331_v63 = vadd.f32 %v330_v61, %v329_v59  ;;  %v341_v0 = vadd.f32 %v340_v62, %v339_v60 }
  0x60   : > { %v332_v1 = vrot.slane %v331_v63, 1  ;;  %v342_v2 = vrot.slane %v341_v0, 1 }
  0x62   : > { %v333_v5 = vadd.f32 %v332_v1, %v331_v63  ;;  %v343_v6 = vadd.f32 %v342_v2, %v341_v0 }
  0x64   : > { %v334_v7 = vadd.f32 %v333_v5, %v326_v3  ;;  %v344_v8 = vadd.f32 %v343_v6, %v336_v4 }
  0x66   : > { %335 = vst [vmem:[%s910_s21] sm:$0x1] %v334_v7 }
  0x67   : > { %345 = vst [vmem:[%s914_s23] sm:$0x1] %v344_v8 }
  0x68   : > { %691 = shalt.err (!%p688_p13)
}
  0x69   : > { %523 = dma.vmem_to_hbm [thread:$0]  (%p858_p9), %s362_s6, 16, %s364_s7, %s347_s15  }
  0x6a   : > { %s351_s21 = scalar_lea.sflag [#allocation9], %s893_s8  ;;  %s706_s23 = sshra.s32 %s377_s11, 4  ;;  %s707_s23 = int_to_ptr.hbm [resolvable:$true] %s706_s23 }
  0x6b   : > { %s708_s22 = scalar_lea.hbm %s707_s23, 1  ;;  %s712_s18 = scalar_lea.hbm %s1004_s3, 2 }
  0x6c   : > { %p709_p0 = scmp.ne.s32.totalorder %s707_s23, %s708_s22  ;;  %p713_p3 = scmp.lt.s32.totalorder %s707_s23, %s1004_s3 }
  0x6d   : > { %p714_p4 = scmp.lt.s32.totalorder %s712_s18, %s708_s22 }
  0x6e   : > { %p710_p1 = pnand %p709_p0, %p858_p9 }
  0x6f   : > { %p715_p5 = por %p714_p4, %p713_p3 }
  0x70   : > { %p711_p2 = pneg %p710_p1 }
  0x72   : > { %p716_p6 = pnand %p715_p5, %p711_p2 }
  0x74   : > { %719 = shalt.err (!%p716_p6)
}
  0x75   : > { %524 = dma.vmem_to_hbm [thread:$0]  (%p858_p9), %s946_s9, 16, %s377_s11, %s351_s21  }
  0x76 PF: > { %s388_s8 = sand.u32 1, %s762_s12   ;;  %p535_p7 = pnand %p507_p12, %p865_p11 }
  0x77   : > { %s389_s6 = scalar_lea.sflag [#allocation4], %s388_s8 }
  0x78   : > { %p536_p8 = pneg %p535_p7 }
  0x7a   : > { %753 = dma.done.wait (%p536_p8), %s389_s6, 16  }
  0x7b   : > { %755 = vsyncadd (%p536_p8), %s389_s6, 4294967280  ;;  %s398_s7 = scalar_lea.sflag [#allocation9], %s388_s8 }
  0x7c   : > { %757 = dma.done.wait (%p536_p8), %s398_s7, 16  }
  0x7d   : > { %759 = vsyncadd (%p536_p8), %s398_s7, 4294967280  ;;  %s26_s17 = sadd.s32 1, %s782_s17   ;;  %s1010_s12 = smov %s766_s13 }
  0x7e   : > { %p23_p10 = scmp.ge.s32.totalorder %s26_s17, 4   ;;  %s1011_s13 = smov %s770_s14 }
  0x7f   : > { %s1012_s14 = smov %s863_s26  ;;  %s1013_s15 = smov %s778_s16 }
  0x80   : > { %s1014_s16 = smov %s1016_s20  ;;  %25 = sbr.rel (!%p23_p10) target bundleno = 10 (0xa), region = 107 }
  0x85   :  { %403 = vsyncpa [#allocation3], 1 }
  0x86   :  { %405 = vsyncpa [#allocation3 + $0x1], 1 }
  0x87   :  { %406 = vsyncpa [#allocation6], 1 }
  0x88   :  { %408 = vsyncpa [#allocation6 + $0x1], 1 }
  0x89   :  { %409 = vsyncpa [#allocation4], 1 }
  0x8a   :  { %411 = vsyncpa [#allocation4 + $0x1], 1 }
  0x8b   :  { %412 = vsyncpa [#allocation9], 1 }
  0x8c   :  { %414 = vsyncpa [#allocation9 + $0x1], 1 }

</bundles_post_ra>
